<compile_context>
chip_gen: v7x
topology: tpu7x:2x2x1
jax: 0.10.0
libtpu: 0.0.40
codegen_flags: <defaults>
</compile_context>

<pallas_src>
import jax
import jax.numpy as jnp
from jax import lax
from jax.experimental import pallas as pl
from jax.experimental.pallas import tpu as pltpu


_X_TILE_BUDGET = 4 << 20  # ~4 MiB per x tile (double-buffered by the pipeline)


def _choose_tiles(B, D, itemsize, row_mult, budget):
    """Pick (TB, TK) from a byte budget; no divisibility requirement on B."""
    # K (feature) tile: whole D if `row_mult` rows of it fit the budget,
    # otherwise the largest lane-aligned (128-multiple) chunk that does.
    if D * itemsize * row_mult <= budget:
        tk = D
    else:
        tk = max(128, (budget // (row_mult * itemsize)) // 128 * 128)
    # Batch tile from the remaining budget; roofline saturates by ~1-2K rows.
    tb = (budget // max(1, tk * itemsize)) // row_mult * row_mult
    tb = max(row_mult, min(tb, 2048))
    if tb >= B:
        tb = B  # one row-tile covers the whole batch (always a legal block)
    return tb, tk


def _make_kernel(transposed_out, needs_k_mask, d_total):
    def kernel(x_ref, w_ref, b_ref, o_ref, acc_ref):
        # x_ref : [TB, TK]   streamed per grid step
        # w_ref : [C,  TK]   resident across batch steps (streamed over K)
        # b_ref : [C, 1] or [1, C]  f32, resident
        # o_ref : [C, TB] or [TB, C]  f32
        # acc   : f32 VMEM scratch, same shape as o_ref
        k = pl.program_id(1)

        @pl.when(k == 0)
        def _init():
            acc_ref[...] = jnp.zeros_like(acc_ref)

        x = x_ref[...]
        w = w_ref[...]
        if needs_k_mask:
            # Last K block extends past D: zero both operands in the padded
            # columns so garbage (possibly NaN) never reaches the accumulator.
            tk = x_ref.shape[1]
            col = lax.broadcasted_iota(jnp.int32, (1, tk), 1)
            valid = (k * tk + col) < d_total
            x = jnp.where(valid, x, 0).astype(x_ref.dtype)
            w = jnp.where(valid, w, 0).astype(w_ref.dtype)

        if transposed_out:
            # acc[C, TB] += W[C, TK] @ X[TB, TK]^T  (lane-dense output blocks)
            acc_ref[...] += lax.dot_general(
                w, x,
                dimension_numbers=(((1,), (1,)), ((), ())),
                preferred_element_type=jnp.float32,
            )
        else:
            # acc[TB, C] += X[TB, TK] @ W[C, TK]^T  (native-layout W, no .T)
            acc_ref[...] += lax.dot_general(
                x, w,
                dimension_numbers=(((1,), (1,)), ((), ())),
                preferred_element_type=jnp.float32,
            )

        @pl.when(k == pl.num_programs(1) - 1)
        def _finalize():
            o_ref[...] = (acc_ref[...] + b_ref[...]).astype(o_ref.dtype)

    return kernel


def logistic_regression_forward(x, weight, bias, *, transposed_out=None,
                                k_tile=None, x_tile_bytes=_X_TILE_BUDGET):
    """Forward pass of nn.Linear(input_dim, output_dim).

    x:      [B, D]   (f32 or bf16 — used as-is, never cast in the wrapper)
    weight: [C, D]   (PyTorch layout, NOT transposed)
    bias:   [C]
    Returns [B, C] float32.
    """
    B, D = x.shape
    C, Dw = weight.shape
    assert D == Dw, "weight must be [output_dim, input_dim]"

    # Match W to x's dtype outside the hot path (W is tiny: [C, D]).
    if weight.dtype != x.dtype:
        weight = weight.astype(x.dtype)

    itemsize = jnp.dtype(x.dtype).itemsize
    sub = {4: 8, 2: 16, 1: 32}.get(itemsize, 8)  # sublane packing granularity

    if transposed_out is None:
        transposed_out = C < 128  # small class count -> lane-dense [C, TB] out
    # For the transposed path TB is the lane dim of the output block, so keep
    # it a 128-multiple (unless it covers the whole batch).
    row_mult = 128 if transposed_out else sub

    TB, TK = _choose_tiles(B, D, itemsize, row_mult, x_tile_bytes)
    if k_tile is not None:
        TK = int(k_tile)
    nb = pl.cdiv(B, TB)
    nk = pl.cdiv(D, TK)
    needs_k_mask = (D % TK) != 0

    bias_f32 = bias.astype(jnp.float32)
    if transposed_out:
        b2 = bias_f32.reshape(C, 1)
        out_shape = jax.ShapeDtypeStruct((C, B), jnp.float32)
        out_spec = pl.BlockSpec((C, TB), lambda i, k: (0, i))
        b_spec = pl.BlockSpec((C, 1), lambda i, k: (0, 0))
        acc_shape = (C, TB)
    else:
        b2 = bias_f32.reshape(1, C)
        out_shape = jax.ShapeDtypeStruct((B, C), jnp.float32)
        out_spec = pl.BlockSpec((TB, C), lambda i, k: (i, 0))
        b_spec = pl.BlockSpec((1, C), lambda i, k: (0, 0))
        acc_shape = (TB, C)

    # Explicit scoped-VMEM budget from the actual footprint (+25% headroom).
    x_bytes = 2 * TB * TK * itemsize            # double-buffered x stream
    w_bytes = 2 * C * TK * itemsize             # weight block (2 bufs)
    o_bytes = 2 * acc_shape[0] * acc_shape[1] * 4
    acc_bytes = acc_shape[0] * acc_shape[1] * 4
    b_bytes = 2 * C * 4
    footprint = x_bytes + w_bytes + o_bytes + acc_bytes + b_bytes
    vmem_limit = int(min(96 << 20, max(16 << 20, footprint * 5 // 4 + (2 << 20))))

    kernel = _make_kernel(transposed_out, needs_k_mask, D)

    cost = pl.CostEstimate(
        flops=2 * B * D * C,
        bytes_accessed=B * D * itemsize + C * D * itemsize + B * C * 4 + C * 4,
        transcendentals=0,
    )

    out = pl.pallas_call(
        kernel,
        out_shape=out_shape,
        grid_spec=pltpu.PrefetchScalarGridSpec(
            num_scalar_prefetch=0,
            grid=(nb, nk),  # K (reduction) axis last
            in_specs=[
                pl.BlockSpec((TB, TK), lambda i, k: (i, k)),  # x: streamed
                pl.BlockSpec((C, TK), lambda i, k: (0, k)),   # W: VMEM-resident per K block
                b_spec,                                       # bias: resident
            ],
            out_specs=out_spec,
            scratch_shapes=[pltpu.VMEM(acc_shape, jnp.float32)],
        ),
        compiler_params=pltpu.CompilerParams(
            dimension_semantics=("parallel", "arbitrary"),
            vmem_limit_bytes=vmem_limit,
        ),
        cost_estimate=cost,
    )(x, weight, b2)

    if transposed_out:
        out = out.T  # tiny [C, B] -> [B, C]; layout plumbing, negligible vs x stream
    return out


if __name__ == "__main__":
    key = jax.random.PRNGKey(0)
    kx, kw, kb, kx2, kw2 = jax.random.split(key, 5)

    # Small shapes consistent with the module:
    # batch=8 samples, input_dim=32 features, output_dim=4 classes.
    batch, input_dim, output_dim = 8, 32, 4

    x = jax.random.normal(kx, (batch, input_dim), dtype=jnp.float32)
    bound = 1.0 / (input_dim ** 0.5)
    weight = jax.random.uniform(kw, (output_dim, input_dim),
                                minval=-bound, maxval=bound, dtype=jnp.float32)
    bias = jax.random.uniform(kb, (output_dim,),
                              minval=-bound, maxval=bound, dtype=jnp.float32)

    ref = x @ weight.T + bias

    # 1) f32, auto path (lane-dense transposed output since C < 128).
    out = jax.block_until_ready(logistic_regression_forward(x, weight, bias))
    assert out.shape == (batch, output_dim)
    assert jnp.allclose(out, ref, atol=1e-5, rtol=1e-5)

    # 2) f32, standard [B, C]-output path (exercised explicitly).
    out_nt = jax.block_until_ready(
        logistic_regression_forward(x, weight, bias, transposed_out=False))
    assert jnp.allclose(out_nt, ref, atol=1e-5, rtol=1e-5)

    # 3) bf16 inputs already in HBM (no wrapper-side cast of x; f32 accumulation).
    x_bf16 = x.astype(jnp.bfloat16)
    w_bf16 = weight.astype(jnp.bfloat16)
    out_bf16 = jax.block_until_ready(
        logistic_regression_forward(x_bf16, w_bf16, bias))
    assert out_bf16.shape == (batch, output_dim)
    assert jnp.allclose(out_bf16, ref, atol=2e-2, rtol=2e-2)

    # 4) K-tiled accumulator path with a masked tail (D % TK != 0).
    d2 = 160
    x2 = jax.random.normal(kx2, (batch, d2), dtype=jnp.float32)
    w2 = jax.random.uniform(kw2, (output_dim, d2),
                            minval=-0.1, maxval=0.1, dtype=jnp.float32)
    ref2 = x2 @ w2.T + bias
    out2 = jax.block_until_ready(
        logistic_regression_forward(x2, w2, bias, k_tile=128))
    assert jnp.allclose(out2, ref2, atol=1e-4, rtol=1e-4)

    print("KERNEL_OK")
</pallas_src>

<mosaic_0001>
module attributes {stable_mosaic.version = 11 : i64} {
  func.func @kernel(%arg0: i32, %arg1: i32, %arg2: memref<8x32xf32, #tpu.memory_space<vmem>>, %arg3: memref<4x32xf32, #tpu.memory_space<vmem>>, %arg4: memref<4x1xf32, #tpu.memory_space<vmem>>, %arg5: memref<4x8xf32, #tpu.memory_space<vmem>>, %arg6: memref<4x8xf32, #tpu.memory_space<vmem>>) attributes {dimension_semantics = [#tpu.dimension_semantics<parallel>, #tpu.dimension_semantics<arbitrary>], iteration_bounds = array<i64: 1, 1>, scalar_prefetch = 0 : i64, scratch_operands = 1 : i64, tpu.core_type = #tpu.core_type<tc>, window_params = [{transform_indices = @transform_0, window_bounds = array<i64: 8, 32>}, {transform_indices = @transform_1, window_bounds = array<i64: 4, 32>}, {pipeline_mode = #tpu.pipeline_mode<synchronous>, transform_indices = @transform_2, window_bounds = array<i64: 4, 1>}, {transform_indices = @transform_3, window_bounds = array<i64: 4, 8>}]} {
    %c0_i32 = arith.constant 0 : i32
    %0 = arith.cmpi eq, %arg1, %c0_i32 : i32
    %1 = arith.extui %0 : i1 to i32
    %c0_i32_0 = arith.constant 0 : i32
    %2 = arith.cmpi ne, %1, %c0_i32_0 : i32
    scf.if %2 {
      %cst_10 = arith.constant 0.000000e+00 : f32
      %12 = vector.broadcast %cst_10 : f32 to vector<4x8xf32>
      %c0_11 = arith.constant 0 : index
      %c0_12 = arith.constant 0 : index
      %13 = vector.load %arg6[%c0_11, %c0_12] : memref<4x8xf32, #tpu.memory_space<vmem>>, vector<4x8xf32>
      tpu.vector_store %arg6[%c0_11, %c0_12], %12 {strides = array<i32>} : memref<4x8xf32, #tpu.memory_space<vmem>>, vector<4x8xf32>,
    } else {
    }
    %c0 = arith.constant 0 : index
    %c0_1 = arith.constant 0 : index
    %3 = vector.load %arg2[%c0, %c0_1] : memref<8x32xf32, #tpu.memory_space<vmem>>, vector<8x32xf32>
    %c0_2 = arith.constant 0 : index
    %c0_3 = arith.constant 0 : index
    %4 = vector.load %arg3[%c0_2, %c0_3] : memref<4x32xf32, #tpu.memory_space<vmem>>, vector<4x32xf32>
    %c0_4 = arith.constant 0 : index
    %c0_5 = arith.constant 0 : index
    %5 = vector.load %arg6[%c0_4, %c0_5] : memref<4x8xf32, #tpu.memory_space<vmem>>, vector<4x8xf32>
    %cst = arith.constant dense<0.000000e+00> : vector<4x8xf32>
    %6 = tpu.matmul %4, %3, %cst {dimension_numbers = #tpu.dot_dimension_numbers<[1], [1], [0], [0], [0, 0, 1, 0], [], []>} : vector<4x32xf32>, vector<8x32xf32>, vector<4x8xf32> -> vector<4x8xf32>
    %7 = arith.addf %5, %6 : vector<4x8xf32>
    %c0_6 = arith.constant 0 : index
    %c0_7 = arith.constant 0 : index
    %8 = vector.load %arg6[%c0_6, %c0_7] : memref<4x8xf32, #tpu.memory_space<vmem>>, vector<4x8xf32>
    tpu.vector_store %arg6[%c0_6, %c0_7], %7 {strides = array<i32>} : memref<4x8xf32, #tpu.memory_space<vmem>>, vector<4x8xf32>,
    %c0_i32_8 = arith.constant 0 : i32
    %9 = arith.cmpi eq, %arg1, %c0_i32_8 : i32
    %10 = arith.extui %9 : i1 to i32
    %c0_i32_9 = arith.constant 0 : i32
    %11 = arith.cmpi ne, %10, %c0_i32_9 : i32
    scf.if %11 {
      %c0_10 = arith.constant 0 : index
      %c0_11 = arith.constant 0 : index
      %12 = vector.load %arg6[%c0_10, %c0_11] : memref<4x8xf32, #tpu.memory_space<vmem>>, vector<4x8xf32>
      %c0_12 = arith.constant 0 : index
      %c0_13 = arith.constant 0 : index
      %13 = vector.load %arg4[%c0_12, %c0_13] : memref<4x1xf32, #tpu.memory_space<vmem>>, vector<4x1xf32>
      %14 = vector.broadcast %13 : vector<4x1xf32> to vector<4x8xf32>
      %15 = arith.addf %12, %14 : vector<4x8xf32>
      %c0_14 = arith.constant 0 : index
      %c0_15 = arith.constant 0 : index
      %16 = vector.load %arg5[%c0_14, %c0_15] : memref<4x8xf32, #tpu.memory_space<vmem>>, vector<4x8xf32>
      tpu.vector_store %arg5[%c0_14, %c0_15], %15 {strides = array<i32>} : memref<4x8xf32, #tpu.memory_space<vmem>>, vector<4x8xf32>,
    } else {
    }
    return
  }
  func.func @transform_0(%arg0: i32, %arg1: i32) -> (i32, i32) {
    %c0_i32 = arith.constant 0 : i32
    return %arg0, %arg1 : i32, i32
  }
  func.func @transform_1(%arg0: i32, %arg1: i32) -> (i32, i32) {
    %c0_i32 = arith.constant 0 : i32
    %c0_i32_0 = arith.constant 0 : i32
    return %c0_i32, %arg1 : i32, i32
  }
  func.func @transform_2(%arg0: i32, %arg1: i32) -> (i32, i32) {
    %c0_i32 = arith.constant 0 : i32
    %c0_i32_0 = arith.constant 0 : i32
    %c0_i32_1 = arith.constant 0 : i32
    return %c0_i32, %c0_i32_0 : i32, i32
  }
  func.func @transform_3(%arg0: i32, %arg1: i32) -> (i32, i32) {
    %c0_i32 = arith.constant 0 : i32
    %c0_i32_0 = arith.constant 0 : i32
    return %c0_i32, %arg0 : i32, i32
  }
}

</mosaic_0001>

<bundles_post_ra>
// kernel: tpu_custom_call.1
= control target key start
LH: loop header
LB: loop body
LE: loop exit
PB: predicated region body
PF: predicated region fallthrough
CT: control target
= control target key end

     0   :  { %8 = vsyncpa [#allocation4], 0  ;;  %s264_s0 = inlined_call_operand.hbm [shape: f32[8,32], index: 0, kind: input, shape index: {}]   ;;  %s265_s1 = inlined_call_operand.vmem [shape: f32[4,32], index: 1, kind: input, shape index: {}]   ;;  %s266_s2 = inlined_call_operand.vmem [shape: f32[4,1], index: 2, kind: input, shape index: {}]   ;;  %s267_s3 = inlined_call_operand.hbm [shape: f32[4,8], index: 3, kind: output, shape index: {}]  }
   0x1   :  { %9 = vsyncpa [#allocation5], 0  ;;  %s206_s12 = smov [#allocation3]   ;;  %s158_s16 = scalar_lea.hbm %s264_s0, 128 }
   0x2   :  { %s16_s13 = sshll.u32 %s206_s12, 4  ;;  %p159_p0 = scmp.ne.s32.totalorder %s264_s0, %s158_s16  ;;  %s17_s13 = int_to_ptr.vmem [resolvable:$true] %s16_s13 }
   0x3   :  { %p162_p1 = scmp.lt.u32.totalorder %s158_s16, %s264_s0 }
   0x5   :  { %p164_p2 = pnand %p162_p1, %p159_p0 }
   0x7   :  { %167 = shalt.err (!%p164_p2)
}
   0x8   :  { %s168_s21 = scalar_lea.vmem %s17_s13, 128  ;;  %p173_p4 = scmp.lt.s32.totalorder %s17_s13, %s17_s13 }
   0x9   :  { %p169_p3 = scmp.ne.s32.totalorder %s17_s13, %s168_s21  ;;  %p174_p5 = scmp.lt.s32.totalorder %s168_s21, %s168_s21 }
   0xb   :  { %p175_p6 = por %p174_p5, %p173_p4 }
   0xd   :  { %p176_p7 = pnand %p175_p6, %p169_p3 }
   0xf   :  { %179 = shalt.err (!%p176_p7)
}
  0x10   :  { %19 = dma.hbm_to_vmem [thread:$0]  %s264_s0, 128, %s17_s13, [#allocation4]  }
  0x11   :  { %202 = dma.done.wait [#allocation4], 128  }
  0x12   :  { %203 = vsyncadd [#allocation4], 4294967168  ;;  %vm31_vm0 = vcmask 60416   ;;  %v207_v0 = vmov 0.0   ;;  %vm208_vm1 = vmmov 0   ;;  %v209_v1 = vmov 0  }
  0x13   :  { %32 = vst.msk [vmem:[#allocation2] sm:$0xf] %vm31_vm0, %v207_v0  ;;  %147 = vmatprep.subr.mxu0 %v207_v0  ;;  %149 = vmatprep.mubr.msk.f32.mxu0 %vm208_vm1, %v207_v0  ;;  %vm36_vm2 = vcmask 261120   ;;  %v33_v2 = vld [vmem:[#allocation3] sm:$0xff]  ;;  %v120_v3 = vld [vmem:[%s266_s2] sm:$0xf] }
  0x14   :  { %157 = vset.pattern.permute.xlu0 %v209_v1  ;;  %148 = vmatpush3.xpose.msk.msra.mxu0 %vm36_vm2, %v33_v2  ;;  %v34_v4 = vld [vmem:[%s265_s1] sm:$0xf]  ;;  %s210_s27 = smov [#allocation6]  }
  0x15   :  { %123 = vperm.xlu0 %157, %v120_v3   ;;  %s134_s28 = sshll.u32 %s210_s27, 4  ;;  %s135_s28 = int_to_ptr.vmem [resolvable:$true] %s134_s28 }
  0x16   :  { %s180_s2 = scalar_lea.vmem %s135_s28, 64  ;;  %p185_p9 = scmp.lt.s32.totalorder %s135_s28, %s135_s28 }
  0x17   :  { %150 = vmatmul.mubr.msk.f32.vlgmr.msra.gmra.mrb[0].mxu0 %vm36_vm2, %v34_v4  ;;  %p181_p8 = scmp.ne.s32.totalorder %s135_s28, %s180_s2  ;;  %p186_p10 = scmp.lt.s32.totalorder %s180_s2, %s180_s2 }
  0x19   :  { %p187_p11 = por %p186_p10, %p185_p9 }
  0x1a   :  { %v35_v5 = vld [vmem:[#allocation2] sm:$0xf] }
  0x1b   :  { %p188_p12 = pnand %p187_p11, %p181_p8 }
  0x94   :  { %v124_v9 = vpop.permute.xlu0 %123 }
  0xea   :  { %v109_v6 = vpop.f32.mrb[0].mxu0 }
  0xeb   :  { %v113_v7 = vadd.f32 %v109_v6, %v35_v5  ;;  %v151_v8 = vpop.f32.mrb[1].mxu0 }
  0xed   :  { %115 = vst.msk [vmem:[#allocation2] sm:$0xf] %vm31_vm0, %v113_v7 }
  0xf4   :  { %v119_v10 = vld [vmem:[#allocation2] sm:$0xf] }
  0xf5   :  { %v126_v11 = vadd.f32 %v124_v9, %v119_v10 }
  0xf7   :  { %127 = vst.msk [vmem:[#allocation6] sm:$0xf] %vm31_vm0, %v126_v11 }
  0xf8   :  { %191 = shalt.err (!%p188_p12)
}
  0xf9   :  { %s192_s30 = scalar_lea.hbm %s267_s3, 64 }
  0xfa   :  { %p193_p13 = scmp.ne.s32.totalorder %s267_s3, %s192_s30  ;;  %p196_p0 = scmp.lt.u32.totalorder %s192_s30, %s267_s3 }
  0xfc   :  { %p198_p1 = pnand %p196_p0, %p193_p13 }
  0xfe   :  { %201 = shalt.err (!%p198_p1)
}
  0xff   :  { %137 = dma.vmem_to_hbm [thread:$0]  %s135_s28, 64, %s267_s3, [#allocation5]  }
 0x100   :  { %204 = dma.done.wait [#allocation5], 64  }
 0x101   :  { %205 = vsyncadd [#allocation5], 4294967232 }
 0x102   :  { %141 = vsyncpa [#allocation4], 1 }
 0x103   :  { %142 = vsyncpa [#allocation5], 1 }

</bundles_post_ra>
